<compile_context>
chip_gen: v7x
topology: tpu7x:2x2x1
jax: 0.10.0
libtpu: 0.0.40
codegen_flags: <defaults>
</compile_context>

<pallas_src>
from functools import partial

import jax
import jax.numpy as jnp
from jax.experimental import pallas as pl
from jax.experimental.pallas import tpu as pltpu


def _round_up(a, b):
    return (a + b - 1) // b * b


def _avgpool_kernel(x_ref, o_ref, acc_ref, *, inv_hw):
    """Process one (TM, THW) tile of the (rows, HW) problem.

    Grid axis 0: row blocks (parallel).  Grid axis 1: HW chunks (reduction).
    acc_ref is a persistent (TM, 128) f32 accumulator in VMEM.
    """
    j = pl.program_id(1)

    @pl.when(j == 0)
    def _():
        acc_ref[...] = jnp.zeros_like(acc_ref)

    thw = x_ref.shape[1]
    acc = acc_ref[...]
    # Chunk-wise accumulation: load 128 lanes at a time, upcast per-chunk and
    # add into the (TM, 128) accumulator -> VPU-only work, low vreg pressure,
    # no materialized f32 copy of the whole tile.
    for c in range(thw // 128):
        acc = acc + x_ref[:, c * 128:(c + 1) * 128].astype(jnp.float32)
    acc_ref[...] = acc

    @pl.when(j == pl.num_programs(1) - 1)
    def _():
        # One small cross-lane (XLU) reduce of the (TM, 128) accumulator.
        row_sum = jnp.sum(acc_ref[...], axis=-1, keepdims=True)
        o_ref[...] = (row_sum * inv_hw).astype(o_ref.dtype)


def avg_pool(feat, dim=(2, 3), keepdim=False):
    """Mean of `feat` (NCHW) over spatial dims, like torch.mean(feat, dim, keepdim)."""
    ndim = feat.ndim
    dims = tuple(sorted(d % ndim for d in (dim if isinstance(dim, (tuple, list)) else (dim,))))
    assert ndim == 4 and dims == (2, 3), (
        "this kernel implements global spatial average pooling over NCHW dims (2, 3)")
    # TODO(synk): other `dim` choices are not used by pool_utils.AvgPool and are not implemented.

    N, C, H, W = feat.shape
    R, HW = N * C, H * W
    itemsize = jnp.dtype(feat.dtype).itemsize

    # ---- tile sizing -------------------------------------------------------
    # Rows: multiple of 8 sublanes, up to 256.  Lanes: multiple of 128, sized so
    # one input tile is <= ~4 MiB (so 2x-buffered input + scratch fits the
    # scoped-VMEM defaults on every generation, including v7x's 64 MiB VMEM).
    TM = min(256, _round_up(R, 8))
    budget_bytes = 4 * 1024 * 1024
    thw_cap = max(128, (budget_bytes // (TM * itemsize)) // 128 * 128)
    hw_128 = _round_up(HW, 128)
    THW = hw_128 if hw_128 <= thw_cap else min(2048, thw_cap)
    R_pad = _round_up(R, TM)
    HW_pad = _round_up(HW, THW)

    # ---- layout glue -------------------------------------------------------
    x2d = feat.reshape(R, HW)
    if (R_pad, HW_pad) != (R, HW):
        # Zero padding is sum-neutral; the mean divides by the true HW below.
        x2d = jnp.pad(x2d, ((0, R_pad - R), (0, HW_pad - HW)))

    grid = (R_pad // TM, HW_pad // THW)

    out = pl.pallas_call(
        partial(_avgpool_kernel, inv_hw=1.0 / float(HW)),
        out_shape=jax.ShapeDtypeStruct((R_pad, 1), feat.dtype),
        grid_spec=pltpu.PrefetchScalarGridSpec(
            num_scalar_prefetch=0,
            grid=grid,
            in_specs=[pl.BlockSpec((TM, THW), lambda i, j: (i, j))],
            out_specs=pl.BlockSpec((TM, 1), lambda i, j: (i, 0)),
            scratch_shapes=[pltpu.VMEM((TM, 128), jnp.float32)],
        ),
        compiler_params=pltpu.CompilerParams(
            dimension_semantics=("parallel", "arbitrary"),
        ),
        cost_estimate=pl.CostEstimate(
            flops=int(N * C * H * W),
            transcendentals=0,
            bytes_accessed=int(N * C * H * W * itemsize + R * itemsize),
        ),
    )(x2d)

    out = out[:R, 0].reshape(N, C)
    if keepdim:
        out = out.reshape(N, C, 1, 1)
    return out


if __name__ == "__main__":
    key = jax.random.PRNGKey(0)
    k1, k2 = jax.random.split(key)

    # Primary test shape (matches the module's typical NCHW feature map).
    x = jax.random.normal(k1, (2, 4, 16, 16), dtype=jnp.float32)
    y = avg_pool(x, dim=(2, 3), keepdim=False)
    y_keep = avg_pool(x, dim=(2, 3), keepdim=True)
    jax.block_until_ready(y)
    jax.block_until_ready(y_keep)

    ref = jnp.mean(x, axis=(2, 3))
    assert y.shape == (2, 4)
    assert y_keep.shape == (2, 4, 1, 1)
    assert jnp.allclose(y, ref, atol=1e-5, rtol=1e-5)
    assert jnp.allclose(y_keep[..., 0, 0], ref, atol=1e-5, rtol=1e-5)

    # Non-128-aligned spatial extent + bf16 exercises the padded / multi-chunk path.
    x2 = jax.random.normal(k2, (2, 16, 24, 40), dtype=jnp.bfloat16)
    y2 = avg_pool(x2, dim=(2, 3), keepdim=False)
    jax.block_until_ready(y2)
    ref2 = jnp.mean(x2.astype(jnp.float32), axis=(2, 3))
    assert y2.shape == (2, 16)
    assert jnp.allclose(y2.astype(jnp.float32), ref2, atol=2e-2, rtol=2e-2)

    print("KERNEL_OK")
</pallas_src>

<mosaic_0001>
module attributes {stable_mosaic.version = 11 : i64} {
  func.func @_avgpool_kernel(%arg0: i32, %arg1: i32, %arg2: memref<8x256xf32, #tpu.memory_space<vmem>>, %arg3: memref<8x1xf32, #tpu.memory_space<vmem>>, %arg4: memref<8x128xf32, #tpu.memory_space<vmem>>) attributes {dimension_semantics = [#tpu.dimension_semantics<parallel>, #tpu.dimension_semantics<arbitrary>], iteration_bounds = array<i64: 1, 1>, scalar_prefetch = 0 : i64, scratch_operands = 1 : i64, tpu.core_type = #tpu.core_type<tc>, window_params = [{transform_indices = @transform_0, window_bounds = array<i64: 8, 256>}, {transform_indices = @transform_1, window_bounds = array<i64: 8, 1>}]} {
    %c0_i32 = arith.constant 0 : i32
    %0 = arith.cmpi eq, %arg1, %c0_i32 : i32
    %1 = arith.extui %0 : i1 to i32
    %c0_i32_0 = arith.constant 0 : i32
    %2 = arith.cmpi ne, %1, %c0_i32_0 : i32
    scf.if %2 {
      %cst = arith.constant 0.000000e+00 : f32
      %12 = vector.broadcast %cst : f32 to vector<8x128xf32>
      %c0_9 = arith.constant 0 : index
      %c0_10 = arith.constant 0 : index
      %13 = vector.load %arg4[%c0_9, %c0_10] : memref<8x128xf32, #tpu.memory_space<vmem>>, vector<8x128xf32>
      tpu.vector_store %arg4[%c0_9, %c0_10], %12 {strides = array<i32>} : memref<8x128xf32, #tpu.memory_space<vmem>>, vector<8x128xf32>,
    } else {
    }
    %c0 = arith.constant 0 : index
    %c0_1 = arith.constant 0 : index
    %3 = vector.load %arg4[%c0, %c0_1] : memref<8x128xf32, #tpu.memory_space<vmem>>, vector<8x128xf32>
    %c0_2 = arith.constant 0 : index
    %c0_3 = arith.constant 0 : index
    %4 = vector.load %arg2[%c0_2, %c0_3] : memref<8x256xf32, #tpu.memory_space<vmem>>, vector<8x128xf32>
    %5 = arith.addf %3, %4 : vector<8x128xf32>
    %c0_4 = arith.constant 0 : index
    %c128 = arith.constant 128 : index
    %6 = vector.load %arg2[%c0_4, %c128] : memref<8x256xf32, #tpu.memory_space<vmem>>, vector<8x128xf32>
    %7 = arith.addf %5, %6 : vector<8x128xf32>
    %c0_5 = arith.constant 0 : index
    %c0_6 = arith.constant 0 : index
    %8 = vector.load %arg4[%c0_5, %c0_6] : memref<8x128xf32, #tpu.memory_space<vmem>>, vector<8x128xf32>
    tpu.vector_store %arg4[%c0_5, %c0_6], %7 {strides = array<i32>} : memref<8x128xf32, #tpu.memory_space<vmem>>, vector<8x128xf32>,
    %c0_i32_7 = arith.constant 0 : i32
    %9 = arith.cmpi eq, %arg1, %c0_i32_7 : i32
    %10 = arith.extui %9 : i1 to i32
    %c0_i32_8 = arith.constant 0 : i32
    %11 = arith.cmpi ne, %10, %c0_i32_8 : i32
    scf.if %11 {
      %c0_9 = arith.constant 0 : index
      %c0_10 = arith.constant 0 : index
      %12 = vector.load %arg4[%c0_9, %c0_10] : memref<8x128xf32, #tpu.memory_space<vmem>>, vector<8x128xf32>
      %cst = arith.constant dense<0.000000e+00> : vector<8xf32>
      %13 = vector.multi_reduction <add>, %12, %cst [1] : vector<8x128xf32> to vector<8xf32>
      %14 = vector.shape_cast %13 : vector<8xf32> to vector<8x1xf32>
      %cst_11 = arith.constant 3.906250e-03 : f32
      %15 = vector.broadcast %cst_11 : f32 to vector<8x1xf32>
      %16 = arith.mulf %14, %15 : vector<8x1xf32>
      %c0_12 = arith.constant 0 : index
      %c0_13 = arith.constant 0 : index
      %17 = vector.load %arg3[%c0_12, %c0_13] : memref<8x1xf32, #tpu.memory_space<vmem>>, vector<8x1xf32>
      tpu.vector_store %arg3[%c0_12, %c0_13], %16 {strides = array<i32>} : memref<8x1xf32, #tpu.memory_space<vmem>>, vector<8x1xf32>,
    } else {
    }
    return
  }
  func.func @transform_0(%arg0: i32, %arg1: i32) -> (i32, i32) {
    %c0_i32 = arith.constant 0 : i32
    return %arg0, %arg1 : i32, i32
  }
  func.func @transform_1(%arg0: i32, %arg1: i32) -> (i32, i32) {
    %c0_i32 = arith.constant 0 : i32
    %c0_i32_0 = arith.constant 0 : i32
    return %arg0, %c0_i32 : i32, i32
  }
}

</mosaic_0001>

<bundles_post_ra>
// kernel: tpu_custom_call.1
= control target key start
LH: loop header
LB: loop body
LE: loop exit
PB: predicated region body
PF: predicated region fallthrough
CT: control target
= control target key end

     0   :  { %6 = vsyncpa [#allocation4], 0  ;;  %s70_s6 = smov [#allocation3]   ;;  %s96_s0 = inlined_call_operand.hbm [shape: f32[8,256], index: 0, kind: input, shape index: {}]   ;;  %s97_s1 = inlined_call_operand.vmem [shape: f32[8,1], index: 1, kind: output, shape index: {}]  }
   0x1   :  { %s13_s7 = sshll.u32 %s70_s6, 4  ;;  %s46_s10 = scalar_lea.hbm %s96_s0, 256  ;;  %s14_s7 = int_to_ptr.vmem [resolvable:$true] %s13_s7 }
   0x2   :  { %p47_p0 = scmp.ne.s32.totalorder %s96_s0, %s46_s10  ;;  %p50_p1 = scmp.lt.u32.totalorder %s46_s10, %s96_s0 }
   0x4   :  { %p52_p2 = pnand %p50_p1, %p47_p0 }
   0x6   :  { %55 = shalt.err (!%p52_p2)
}
   0x7   :  { %s56_s15 = scalar_lea.vmem %s14_s7, 256  ;;  %p61_p4 = scmp.lt.s32.totalorder %s14_s7, %s14_s7 }
   0x8   :  { %p57_p3 = scmp.ne.s32.totalorder %s14_s7, %s56_s15  ;;  %p62_p5 = scmp.lt.s32.totalorder %s56_s15, %s56_s15 }
   0xa   :  { %p63_p6 = por %p62_p5, %p61_p4 }
   0xc   :  { %p64_p7 = pnand %p63_p6, %p57_p3 }
   0xe   :  { %67 = shalt.err (!%p64_p7)
}
   0xf   :  { %16 = dma.hbm_to_vmem [thread:$0]  %s96_s0, 256, %s14_s7, [#allocation4]  }
  0x10   :  { %68 = dma.done.wait [#allocation4], 256  }
  0x11   :  { %69 = vsyncadd [#allocation4], 4294967040  ;;  %v26_v0 = vld [vmem:[#allocation3] sm:$0xff]  ;;  %v28_v1 = vld [vmem:[#allocation3 + $0x8] sm:$0xff]  ;;  %vm38_vm0 = vcmask 7168  }
  0x12   :  { %v29_v2 = vadd.f32 %v28_v1, %v26_v0 }
  0x14   :  { %35 = vadd.xlane.f32.xlu0 %v29_v2 }
  0xa1   :  { %v36_v3 = vpop.xlane.xlu0 %35 }
  0xa2   :  { %v37_v4 = vmul.f32 0.00390625, %v36_v3 }
  0xa4   :  { %39 = vst.msk [vmem:[%s97_s1] sm:$0xff] %vm38_vm0, %v37_v4 }
  0xa5   :  { %44 = vsyncpa [#allocation4], 1 }

</bundles_post_ra>
